<compile_context>
chip_gen: v6e
topology: v6e:2x2x1
jax: 0.10.0
libtpu: 0.0.40
codegen_flags: <defaults>
</compile_context>

<pallas_src>
import math
import functools

import jax
import jax.numpy as jnp
from jax.experimental import pallas as pl
from jax.experimental.pallas import tpu as pltpu


def _mha_kernel(x_ref, wq_ref, wk_ref, wv_ref, wu_ref, bu_ref, o_ref, *,
                num_heads, head_dim, scale, approx_recip):
    H, Dh = num_heads, head_dim
    E = H * Dh

    x = x_ref[0]                      # (S, E) in compute dtype (f32 or bf16)
    S = x.shape[0]
    cdt = x.dtype

    # --- fused full-width projections: (S,E) @ (E,E), f32 accumulation on the MXU
    q = jnp.dot(x, wq_ref[...], preferred_element_type=jnp.float32) * scale   # (S, E)
    k = jnp.dot(x, wk_ref[...], preferred_element_type=jnp.float32)           # (S, E)
    v = jnp.dot(x, wv_ref[...], preferred_element_type=jnp.float32)           # (S, E)
    # (head_weights already folded into the value-projection columns in the wrapper.)

    # --- split heads: (S, E) -> (H, S, Dh)
    qh = jnp.transpose(q.reshape(S, H, Dh), (1, 0, 2)).astype(cdt)
    kh = jnp.transpose(k.reshape(S, H, Dh), (1, 0, 2)).astype(cdt)
    vh = jnp.transpose(v.reshape(S, H, Dh), (1, 0, 2)).astype(cdt)

    # --- batched attention over all heads at once (no per-head grid steps)
    scores = jnp.einsum('hqd,hkd->hqk', qh, kh,
                        preferred_element_type=jnp.float32)                   # (H, S, S)
    m = jnp.max(scores, axis=-1, keepdims=True)
    p = jnp.exp(scores - m)
    denom = jnp.sum(p, axis=-1, keepdims=True)
    p = p * pl.reciprocal(denom, approx=approx_recip)       # EUP, not a VPU divide
    # TODO(synk): attention-weight dropout would be applied here in training mode.

    out_h = jnp.einsum('hqk,hkd->hqd', p.astype(cdt), vh,
                       preferred_element_type=jnp.float32)                    # (H, S, Dh)

    # --- merge heads and unify: (S, E) @ (E, E) + bias
    out_cat = jnp.transpose(out_h, (1, 0, 2)).reshape(S, E).astype(cdt)
    o = jnp.dot(out_cat, wu_ref[...], preferred_element_type=jnp.float32)     # (S, E)
    o_ref[0] = (o + bu_ref[...]).astype(o_ref.dtype)


def dynamic_mha(x, wq, wk, wv, wu, bu, head_weights, *, num_heads,
                compute_dtype=jnp.bfloat16):
    """x: (B, S, E); wq/wk/wv/wu: (E, E) in PyTorch Linear (out, in) layout; bu: (E,);
    head_weights: (H,). Returns (B, S, E) float32 (self-attention, no mask, eval)."""
    B, S, E = x.shape
    H = num_heads
    Dh = E // H
    scale = Dh ** (-0.5)

    # Pre-transpose to (in, out) so all in-kernel matmuls are NN dots (no .T on tiles).
    wq_t = wq.T
    wk_t = wk.T
    # Fold the dynamic head weights into the value projection columns:
    #   (attn @ v_h) * hw[h] == attn @ (v_h * hw[h])
    wv_t = wv.T * jnp.repeat(head_weights, Dh)[None, :]
    wu_t = wu.T
    bu2 = bu.reshape(1, E).astype(jnp.float32)

    cdt = jnp.dtype(compute_dtype)
    x_c = x.astype(cdt)
    wq_t = wq_t.astype(cdt)
    wk_t = wk_t.astype(cdt)
    wv_t = wv_t.astype(cdt)
    wu_t = wu_t.astype(cdt)

    kernel = functools.partial(
        _mha_kernel,
        num_heads=H, head_dim=Dh, scale=scale,
        approx_recip=(cdt != jnp.dtype(jnp.float32)),
    )

    grid_spec = pltpu.PrefetchScalarGridSpec(
        num_scalar_prefetch=0,
        grid=(B,),
        in_specs=[
            pl.BlockSpec((1, S, E), lambda b: (b, 0, 0)),   # x (one batch row)
            pl.BlockSpec((E, E), lambda b: (0, 0)),         # W_q^T (in, out)
            pl.BlockSpec((E, E), lambda b: (0, 0)),         # W_k^T
            pl.BlockSpec((E, E), lambda b: (0, 0)),         # W_v^T * head_weights
            pl.BlockSpec((E, E), lambda b: (0, 0)),         # W_unify^T
            pl.BlockSpec((1, E), lambda b: (0, 0)),         # unify bias
        ],
        out_specs=pl.BlockSpec((1, S, E), lambda b: (b, 0, 0)),
    )

    return pl.pallas_call(
        kernel,
        out_shape=jax.ShapeDtypeStruct((B, S, E), jnp.float32),
        grid_spec=grid_spec,
        compiler_params=pltpu.CompilerParams(
            dimension_semantics=("parallel",)),
    )(x_c, wq_t, wk_t, wv_t, wu_t, bu2)


def dynamic_mha_reference(x, wq, wk, wv, wu, bu, head_weights, *, num_heads):
    """Pure-JAX reference mirroring the PyTorch forward (y=None, mask=None, eval)."""
    B, S, E = x.shape
    H = num_heads
    Dh = E // H
    q = (x @ wq.T).reshape(B, S, H, Dh).transpose(0, 2, 1, 3)
    k = (x @ wk.T).reshape(B, S, H, Dh).transpose(0, 2, 1, 3)
    v = (x @ wv.T).reshape(B, S, H, Dh).transpose(0, 2, 1, 3)
    scores = jnp.einsum("bhqd,bhkd->bhqk", q, k) * (Dh ** -0.5)
    attn = jax.nn.softmax(scores, axis=-1)
    out = jnp.einsum("bhqk,bhkd->bhqd", attn, v)
    out = out * head_weights.reshape(1, H, 1, 1)
    out = out.transpose(0, 2, 1, 3).reshape(B, S, E)
    return out @ wu.T + bu


if __name__ == "__main__":
    B, S, E, H = 2, 8, 32, 8
    key = jax.random.PRNGKey(0)
    kx, k1, k2, k3, k4, k5 = jax.random.split(key, 6)

    x = jax.random.normal(kx, (B, S, E), dtype=jnp.float32)

    # Deterministic parameter init (PyTorch Linear-ish uniform scale).
    bound = 1.0 / math.sqrt(E)
    wq = jax.random.uniform(k1, (E, E), jnp.float32, -bound, bound)
    wk = jax.random.uniform(k2, (E, E), jnp.float32, -bound, bound)
    wv = jax.random.uniform(k3, (E, E), jnp.float32, -bound, bound)
    wu = jax.random.uniform(k4, (E, E), jnp.float32, -bound, bound)
    bu = jax.random.uniform(k5, (E,), jnp.float32, -bound, bound)
    head_weights = jnp.ones((H,), jnp.float32) / H   # nn.Parameter(torch.ones(H)/H)

    ref = dynamic_mha_reference(x, wq, wk, wv, wu, bu, head_weights, num_heads=H)

    # Exact-precision path (f32 operands) -- tight check against the reference.
    out_f32 = dynamic_mha(x, wq, wk, wv, wu, bu, head_weights,
                          num_heads=H, compute_dtype=jnp.float32)
    out_f32 = jax.block_until_ready(out_f32)
    assert out_f32.shape == (B, S, E)
    assert jnp.allclose(out_f32, ref, atol=1e-4, rtol=1e-4), "f32 mismatch vs reference"

    # Throughput path (bf16 MXU operands, f32 accumulation) -- loose check.
    out_bf16 = dynamic_mha(x, wq, wk, wv, wu, bu, head_weights,
                           num_heads=H, compute_dtype=jnp.bfloat16)
    out_bf16 = jax.block_until_ready(out_bf16)
    assert out_bf16.shape == (B, S, E)
    assert jnp.allclose(out_bf16, ref, atol=5e-2, rtol=5e-2), "bf16 mismatch vs reference"

    print("KERNEL_OK")
</pallas_src>

<mosaic_0001>
module attributes {stable_mosaic.version = 11 : i64} {
  func.func @_mha_kernel(%arg0: i32, %arg1: memref<1x8x32xf32, #tpu.memory_space<vmem>>, %arg2: memref<32x32xf32, #tpu.memory_space<vmem>>, %arg3: memref<32x32xf32, #tpu.memory_space<vmem>>, %arg4: memref<32x32xf32, #tpu.memory_space<vmem>>, %arg5: memref<32x32xf32, #tpu.memory_space<vmem>>, %arg6: memref<1x32xf32, #tpu.memory_space<vmem>>, %arg7: memref<1x8x32xf32, #tpu.memory_space<vmem>>) attributes {dimension_semantics = [#tpu.dimension_semantics<parallel>], iteration_bounds = array<i64: 2>, scalar_prefetch = 0 : i64, scratch_operands = 0 : i64, tpu.core_type = #tpu.core_type<tc>, window_params = [{transform_indices = @transform_0, window_bounds = array<i64: 1, 8, 32>}, {pipeline_mode = #tpu.pipeline_mode<synchronous>, transform_indices = @transform_1, window_bounds = array<i64: 32, 32>}, {pipeline_mode = #tpu.pipeline_mode<synchronous>, transform_indices = @transform_2, window_bounds = array<i64: 32, 32>}, {pipeline_mode = #tpu.pipeline_mode<synchronous>, transform_indices = @transform_3, window_bounds = array<i64: 32, 32>}, {pipeline_mode = #tpu.pipeline_mode<synchronous>, transform_indices = @transform_4, window_bounds = array<i64: 32, 32>}, {pipeline_mode = #tpu.pipeline_mode<synchronous>, transform_indices = @transform_5, window_bounds = array<i64: 1, 32>}, {transform_indices = @transform_6, window_bounds = array<i64: 1, 8, 32>}]} {
    %c0 = arith.constant 0 : index
    %c0_0 = arith.constant 0 : index
    %c0_1 = arith.constant 0 : index
    %0 = vector.load %arg1[%c0, %c0_0, %c0_1] : memref<1x8x32xf32, #tpu.memory_space<vmem>>, vector<1x8x32xf32>
    %1 = vector.shape_cast %0 : vector<1x8x32xf32> to vector<8x32xf32>
    %c0_2 = arith.constant 0 : index
    %c0_3 = arith.constant 0 : index
    %2 = vector.load %arg2[%c0_2, %c0_3] : memref<32x32xf32, #tpu.memory_space<vmem>>, vector<32x32xf32>
    %cst = arith.constant dense<0.000000e+00> : vector<8x32xf32>
    %3 = tpu.matmul %1, %2, %cst {dimension_numbers = #tpu.dot_dimension_numbers<[1], [0], [0], [1], [0, 0, 1, 1], [], []>} : vector<8x32xf32>, vector<32x32xf32>, vector<8x32xf32> -> vector<8x32xf32>
    %cst_4 = arith.constant 5.000000e-01 : f32
    %4 = vector.broadcast %cst_4 : f32 to vector<8x32xf32>
    %5 = arith.mulf %3, %4 : vector<8x32xf32>
    %c0_5 = arith.constant 0 : index
    %c0_6 = arith.constant 0 : index
    %6 = vector.load %arg3[%c0_5, %c0_6] : memref<32x32xf32, #tpu.memory_space<vmem>>, vector<32x32xf32>
    %cst_7 = arith.constant dense<0.000000e+00> : vector<8x32xf32>
    %7 = tpu.matmul %1, %6, %cst_7 {dimension_numbers = #tpu.dot_dimension_numbers<[1], [0], [0], [1], [0, 0, 1, 1], [], []>} : vector<8x32xf32>, vector<32x32xf32>, vector<8x32xf32> -> vector<8x32xf32>
    %c0_8 = arith.constant 0 : index
    %c0_9 = arith.constant 0 : index
    %8 = vector.load %arg4[%c0_8, %c0_9] : memref<32x32xf32, #tpu.memory_space<vmem>>, vector<32x32xf32>
    %cst_10 = arith.constant dense<0.000000e+00> : vector<8x32xf32>
    %9 = tpu.matmul %1, %8, %cst_10 {dimension_numbers = #tpu.dot_dimension_numbers<[1], [0], [0], [1], [0, 0, 1, 1], [], []>} : vector<8x32xf32>, vector<32x32xf32>, vector<8x32xf32> -> vector<8x32xf32>
    %10 = vector.shape_cast %5 : vector<8x32xf32> to vector<8x8x4xf32>
    %11 = tpu.transpose %10, [1, 0, 2] : vector<8x8x4xf32> -> vector<8x8x4xf32>
    %12 = vector.shape_cast %7 : vector<8x32xf32> to vector<8x8x4xf32>
    %13 = tpu.transpose %12, [1, 0, 2] : vector<8x8x4xf32> -> vector<8x8x4xf32>
    %14 = vector.shape_cast %9 : vector<8x32xf32> to vector<8x8x4xf32>
    %15 = tpu.transpose %14, [1, 0, 2] : vector<8x8x4xf32> -> vector<8x8x4xf32>
    "tpu.trace_start"() <{level = 10 : i32, message = "hqd,hkd->hqk"}> : () -> ()
    %cst_11 = arith.constant dense<0.000000e+00> : vector<8x8x8xf32>
    %16 = tpu.matmul %11, %13, %cst_11 {dimension_numbers = #tpu.dot_dimension_numbers<[2], [2], [1], [1], [0, 0, 0, 1, 1, 1], [0], [0]>} : vector<8x8x4xf32>, vector<8x8x4xf32>, vector<8x8x8xf32> -> vector<8x8x8xf32>
    "tpu.trace_stop"() : () -> ()
    %cst_12 = arith.constant dense<0xFF800000> : vector<8x8xf32>
    %17 = vector.multi_reduction <maximumf>, %16, %cst_12 [2] : vector<8x8x8xf32> to vector<8x8xf32>
    %18 = vector.shape_cast %17 : vector<8x8xf32> to vector<8x8x1xf32>
    %19 = vector.broadcast %18 : vector<8x8x1xf32> to vector<8x8x8xf32>
    %20 = arith.subf %16, %19 : vector<8x8x8xf32>
    %21 = math.exp %20 : vector<8x8x8xf32>
    %cst_13 = arith.constant dense<0.000000e+00> : vector<8x8xf32>
    %22 = vector.multi_reduction <add>, %21, %cst_13 [2] : vector<8x8x8xf32> to vector<8x8xf32>
    %23 = vector.shape_cast %22 : vector<8x8xf32> to vector<8x8x1xf32>
    %24 = tpu.reciprocal %23 : vector<8x8x1xf32> -> vector<8x8x1xf32>
    %25 = vector.broadcast %24 : vector<8x8x1xf32> to vector<8x8x8xf32>
    %26 = arith.mulf %21, %25 : vector<8x8x8xf32>
    "tpu.trace_start"() <{level = 10 : i32, message = "hqk,hkd->hqd"}> : () -> ()
    %cst_14 = arith.constant dense<0.000000e+00> : vector<8x8x4xf32>
    %27 = tpu.matmul %26, %15, %cst_14 {dimension_numbers = #tpu.dot_dimension_numbers<[2], [1], [1], [2], [0, 0, 0, 1, 1, 2], [0], [0]>} : vector<8x8x8xf32>, vector<8x8x4xf32>, vector<8x8x4xf32> -> vector<8x8x4xf32>
    "tpu.trace_stop"() : () -> ()
    %28 = tpu.transpose %27, [1, 0, 2] : vector<8x8x4xf32> -> vector<8x8x4xf32>
    %29 = vector.shape_cast %28 : vector<8x8x4xf32> to vector<8x32xf32>
    %c0_15 = arith.constant 0 : index
    %c0_16 = arith.constant 0 : index
    %30 = vector.load %arg5[%c0_15, %c0_16] : memref<32x32xf32, #tpu.memory_space<vmem>>, vector<32x32xf32>
    %cst_17 = arith.constant dense<0.000000e+00> : vector<8x32xf32>
    %31 = tpu.matmul %29, %30, %cst_17 {dimension_numbers = #tpu.dot_dimension_numbers<[1], [0], [0], [1], [0, 0, 1, 1], [], []>} : vector<8x32xf32>, vector<32x32xf32>, vector<8x32xf32> -> vector<8x32xf32>
    %c0_18 = arith.constant 0 : index
    %c0_19 = arith.constant 0 : index
    %32 = vector.load %arg6[%c0_18, %c0_19] : memref<1x32xf32, #tpu.memory_space<vmem>>, vector<1x32xf32>
    %33 = vector.broadcast %32 : vector<1x32xf32> to vector<8x32xf32>
    %34 = arith.addf %31, %33 : vector<8x32xf32>
    %c0_20 = arith.constant 0 : index
    %c0_21 = arith.constant 0 : index
    %c0_22 = arith.constant 0 : index
    %35 = vector.load %arg7[%c0_20, %c0_21, %c0_22] : memref<1x8x32xf32, #tpu.memory_space<vmem>>, vector<1x8x32xf32>
    %36 = vector.shape_cast %35 : vector<1x8x32xf32> to vector<8x32xf32>
    %37 = vector.shape_cast %34 : vector<8x32xf32> to vector<1x8x32xf32>
    tpu.vector_store %arg7[%c0_20, %c0_21, %c0_22], %37 {strides = array<i32>} : memref<1x8x32xf32, #tpu.memory_space<vmem>>, vector<1x8x32xf32>,
    return
  }
  func.func @transform_0(%arg0: i32) -> (i32, i32, i32) {
    %c0_i32 = arith.constant 0 : i32
    %c0_i32_0 = arith.constant 0 : i32
    %c0_i32_1 = arith.constant 0 : i32
    return %arg0, %c0_i32, %c0_i32_0 : i32, i32, i32
  }
  func.func @transform_1(%arg0: i32) -> (i32, i32) {
    %c0_i32 = arith.constant 0 : i32
    %c0_i32_0 = arith.constant 0 : i32
    %c0_i32_1 = arith.constant 0 : i32
    return %c0_i32, %c0_i32_0 : i32, i32
  }
  func.func @transform_2(%arg0: i32) -> (i32, i32) {
    %c0_i32 = arith.constant 0 : i32
    %c0_i32_0 = arith.constant 0 : i32
    %c0_i32_1 = arith.constant 0 : i32
    return %c0_i32, %c0_i32_0 : i32, i32
  }
  func.func @transform_3(%arg0: i32) -> (i32, i32) {
    %c0_i32 = arith.constant 0 : i32
    %c0_i32_0 = arith.constant 0 : i32
    %c0_i32_1 = arith.constant 0 : i32
    return %c0_i32, %c0_i32_0 : i32, i32
  }
  func.func @transform_4(%arg0: i32) -> (i32, i32) {
    %c0_i32 = arith.constant 0 : i32
    %c0_i32_0 = arith.constant 0 : i32
    %c0_i32_1 = arith.constant 0 : i32
    return %c0_i32, %c0_i32_0 : i32, i32
  }
  func.func @transform_5(%arg0: i32) -> (i32, i32) {
    %c0_i32 = arith.constant 0 : i32
    %c0_i32_0 = arith.constant 0 : i32
    %c0_i32_1 = arith.constant 0 : i32
    return %c0_i32, %c0_i32_0 : i32, i32
  }
  func.func @transform_6(%arg0: i32) -> (i32, i32, i32) {
    %c0_i32 = arith.constant 0 : i32
    %c0_i32_0 = arith.constant 0 : i32
    %c0_i32_1 = arith.constant 0 : i32
    return %arg0, %c0_i32, %c0_i32_0 : i32, i32, i32
  }
}

</mosaic_0001>

<bundles_post_ra>
// kernel: tpu_custom_call.1
= control target key start
LH: loop header
LB: loop body
LE: loop exit
PB: predicated region body
PF: predicated region fallthrough
CT: control target
= control target key end

     0   :  { %s4489_s0 = inlined_call_operand.hbm [shape: f32[2,8,32], index: 0, kind: input, shape index: {}]   ;;  %s4490_s1 = inlined_call_operand.hbm [shape: f32[32,32], index: 1, kind: input, shape index: {}]   ;;  %s4491_s2 = inlined_call_operand.hbm [shape: f32[32,32], index: 2, kind: input, shape index: {}]   ;;  %s4492_s3 = inlined_call_operand.hbm [shape: f32[32,32], index: 3, kind: input, shape index: {}]   ;;  %s4493_s4 = inlined_call_operand.hbm [shape: f32[32,32], index: 4, kind: input, shape index: {}]   ;;  %s4494_s5 = inlined_call_operand.vmem [shape: f32[1,32], index: 5, kind: input, shape index: {}]   ;;  %s4495_s6 = inlined_call_operand.hbm [shape: f32[2,8,32], index: 6, kind: output, shape index: {}]  }
   0x1   :  { %4500 = sst [smem:[#allocation16_spill]] %s4490_s1 }
   0x2   :  { %11 = vsyncpa [#allocation3], 0 }
   0x3   :  { %13 = vsyncpa [#allocation3 + $0x1], 0 }
   0x4   :  { %14 = vsyncpa [#allocation6], 0 }
   0x5   :  { %15 = vsyncpa [#allocation9], 0 }
   0x6   :  { %16 = vsyncpa [#allocation4], 0 }
   0x7   :  { %18 = vsyncpa [#allocation4 + $0x1], 0  ;;  %s3899_s21 = smov 0   ;;  %s3901_s22 = smov 0  }
   0x8   :  { %s3903_s23 = smov 0   ;;  %s3905_s24 = smov 0  }
   0x9 LB: > { %s3838_s25 = smov [#allocation5]   ;;  %s3920_s27 = sadd.s32 4294967295, %s3836_s24   ;;  %s3836_s24 = sphi %s3905_s24, %s4521_s24   ;;  %s3832_s23 = sphi %s3903_s23, %s4520_s23   ;;  %s3828_s22 = sphi %s3901_s22, %s4519_s22   ;;  %s3824_s21 = sphi %s3899_s21, %s4518_s21  }
   0xa   : > { %s198_s26 = sshll.u32 %s3838_s25, 4  ;;  %p3237_p0 = scmp.ge.s32.totalorder %s3836_s24, 1  ;;  %s199_s26 = int_to_ptr.vmem [resolvable:$true] %s198_s26 }
   0xb   : > { %p4496_p1 = scmp.eq.s32.totalorder %s3920_s27, 0  ;;  %p186_p2 = scmp.lt.s32.totalorder %s3836_s24, 3 }
   0xc   : > { %s3839_s29 = smov [#allocation8]   ;;  %s3840_s8 = smov [#allocation7]  }
   0xd   : > { %p3925_p3 = pnand %p3237_p0, %p186_p2  ;;  %s224_s30 = sshll.u32 %s3839_s29, 4  ;;  %s3938_s30 = int_to_ptr.vmem [resolvable:$true] %s224_s30 }
   0xe   : > { %s211_s9 = sshll.u32 %s3840_s8, 4  ;;  %s3643_s10 = scalar_lea.vmem %s199_s26, 512  ;;  %s3940_s9 = int_to_ptr.vmem [resolvable:$true] %s211_s9 }
   0xf   : > { %s4501_s28 = scalar_select %p3925_p3, 1, 0 }
  0x10   : > { %p3513_p5 = pneg %p3925_p3  ;;  %p3644_p8 = scmp.ne.s32.totalorder %s199_s26, %s3643_s10 }
  0x11   : > { %p3651_p11 = scmp.lt.s32.totalorder %s199_s26, %s199_s26  ;;  %p3652_p12 = scmp.lt.s32.totalorder %s3643_s10, %s3643_s10 }
  0x12   : > { %p3934_p6 = pnand %p3513_p5, %p4496_p1 }
  0x13   : > { %p3653_p13 = por %p3652_p12, %p3651_p11 }
  0x14   : > { %p3634_p7 = pneg %p3934_p6 }
  0x16   : > { %p3646_p9 = pnand %p3644_p8, %p3634_p7 }
  0x18   : > { %p3647_p10 = pneg %p3646_p9 }
  0x1a   : > { %p3654_p0 = pnand %p3653_p13, %p3647_p10 }
  0x1c   : > { %3657 = shalt.err (!%p3654_p0)
}
  0x1d   : > { %s3841_s11 = smov 128   ;;  %s3842_s12 = smov 8  }
  0x1e   : > { %s4503_s1 = sld [smem:[#allocation16_spill]]  ;;  %s3669_s15 = scalar_lea.vmem %s3938_s30, 512 }
  0x1f   : > { %p3670_p2 = scmp.ne.s32.totalorder %s3938_s30, %s3669_s15  ;;  %p3677_p9 = scmp.lt.s32.totalorder %s3938_s30, %s3938_s30 }
  0x20   : > { %p3678_p10 = scmp.lt.s32.totalorder %s3669_s15, %s3669_s15 }
  0x21   : > { %p3672_p5 = pnand %p3670_p2, %p3634_p7 }
  0x22   : > { %p3679_p11 = por %p3678_p10, %p3677_p9 }
  0x23   : > { %p3673_p8 = pneg %p3672_p5 }
  0x24   : > { %3516 = dma.hbm_to_vmem [thread:$0]  (!%p3934_p6), %s4503_s1, 512, %s199_s26, [#allocation6], %s3841_s11, %s3841_s11, %s3842_s12  }
  0x25   : > { %p3680_p12 = pnand %p3679_p11, %p3673_p8 }
  0x27   : > { %3683 = shalt.err (!%p3680_p12)
}
  0x28   : > { %3522 = dma.hbm_to_vmem [thread:$0]  (!%p3934_p6), %s4492_s3, 512, %s3938_s30, [#allocation9], %s3841_s11, %s3841_s11, %s3842_s12  }
  0x29   : > { %s3695_s18 = scalar_lea.vmem %s3940_s9, 512  ;;  %p3703_p5 = scmp.lt.s32.totalorder %s3940_s9, %s3940_s9 }
  0x2a   : > { %p3696_p13 = scmp.ne.s32.totalorder %s3940_s9, %s3695_s18  ;;  %p3704_p8 = scmp.lt.s32.totalorder %s3695_s18, %s3695_s18 }
  0x2c   : > { %p3698_p0 = pnand %p3696_p13, %p3634_p7  ;;  %p3705_p9 = por %p3704_p8, %p3703_p5 }
  0x2e   : > { %p3699_p2 = pneg %p3698_p0 }
  0x30   : > { %p3706_p10 = pnand %p3705_p9, %p3699_p2 }
  0x32   : > { %3709 = shalt.err (!%p3706_p10)
}
  0x33   : > { %3519 = dma.hbm_to_vmem [thread:$0]  (!%p3934_p6), %s4491_s2, 512, %s3940_s9, [#allocation6], %s3841_s11, %s3841_s11, %s3842_s12  }
  0x34   : > { %s3843_s25 = smov [#allocation10]  }
  0x35   : > { %s237_s26 = sshll.u32 %s3843_s25, 4  ;;  %s238_s26 = int_to_ptr.vmem [resolvable:$true] %s237_s26 }
  0x36   : > { %s3721_s29 = scalar_lea.vmem %s238_s26, 512  ;;  %p3729_p0 = scmp.lt.s32.totalorder %s238_s26, %s238_s26 }
  0x37   : > { %p3722_p11 = scmp.ne.s32.totalorder %s238_s26, %s3721_s29  ;;  %p3730_p2 = scmp.lt.s32.totalorder %s3721_s29, %s3721_s29 }
  0x39   : > { %p3724_p12 = pnand %p3722_p11, %p3634_p7  ;;  %p3731_p5 = por %p3730_p2, %p3729_p0 }
  0x3b   : > { %p3725_p13 = pneg %p3724_p12 }
  0x3d   : > { %p3732_p8 = pnand %p3731_p5, %p3725_p13 }
  0x3f   : > { %3735 = shalt.err (!%p3732_p8)
}
  0x40   : > { %3525 = dma.hbm_to_vmem [thread:$0]  (!%p3934_p6), %s4493_s4, 512, %s238_s26, [#allocation9], %s3841_s11, %s3841_s11, %s3842_s12  }
  0x41   : > { %s3236_s7 = sadd.s32 4294967294, %s3836_s24   ;;  %s4000_s9 = sadd.s32 1, %s3836_s24  }
  0x42   : > { %s28_s10 = ssub.s32 %s3836_s24, %s4000_s9  ;;  %s31_s13 = sadd.s32 1, %s3832_s23 }
  0x43   : > { %p29_p7 = scmp.eq.s32.totalorder %s28_s10, 0  ;;  %p38_p9 = scmp.ne.s32.totalorder %s3832_s23, %s3828_s22 }
  0x44   : > { %p39_p10 = scmp.eq.s32.totalorder %s3836_s24, 0  ;;  %p44_p11 = scmp.ne.s32.totalorder %s3828_s22, %s3824_s21 }
  0x45   : > { %s4011_s14 = scalar_select %p29_p7, %s3832_s23, %s31_s13  }
  0x46   : > { %p4013_p12 = por %p39_p10, %p38_p9  ;;  %p4019_p6 = por %p4496_p1, %p44_p11 }
  0x47   : > { %p173_p13 = scmp.eq.s32.totalorder %s3920_s27, 1  ;;  %p179_p0 = scmp.eq.s32.totalorder %s3236_s7, 1 }
  0x48   : > { %s4505_s11 = scalar_select %p4019_p6, 1, 0 }
  0x49   : > { %p3538_p2 = scmp.lt.s32.totalorder %s3836_s24, 2  ;;  %s254_s12 = sand.u32 1, %s3832_s23  }
  0x4a   : > { %p4026_p5 = por %p173_p13, %p38_p9  ;;  %p4030_p8 = por %p179_p0, %p44_p11 }
  0x4b   : > { %s3243_s18 = sshll.u32 %s254_s12, 3  ;;  %s3244_s19 = sshll.u32 %s3836_s24, 7 }
  0x4c   : > { %s4506_s16 = scalar_select %p4026_p5, 1, 0 }
  0x4d   : > { %s4507_s17 = scalar_select %p4030_p8, 1, 0 }
  0x4e   : > { %s4038_s26 = scalar_lea.hbm %s4489_s0, %s3244_s19  ;;  %s258_s29 = scalar_lea.vmem [#allocation2], %s3243_s18 }
  0x4f   : > { %s265_s30 = sshll.u32 %s258_s29, 4  ;;  %p4042_p7 = pnand %p3538_p2, %p4013_p12  ;;  %s266_s30 = int_to_ptr.vmem [resolvable:$true] %s265_s30 }
  0x50   : > { %s255_s7 = scalar_lea.sflag [#allocation3], %s254_s12  ;;  %s3736_s10 = scalar_lea.hbm %s4038_s26, 128 }
  0x51   : > { %p3737_p9 = scmp.ne.s32.totalorder %s4038_s26, %s3736_s10  ;;  %p3738_p10 = pneg %p4042_p7 }
  0x52   : > { %s3741_s20 = scalar_lea.hbm %s4489_s0, 256  ;;  %p3742_p0 = scmp.lt.s32.totalorder %s4038_s26, %s4489_s0 }
  0x53   : > { %p3739_p11 = pnand %p3738_p10, %p3737_p9  ;;  %p3743_p12 = scmp.lt.s32.totalorder %s3741_s20, %s3736_s10 }
  0x55   : > { %p3740_p13 = pneg %p3739_p11  ;;  %p3744_p2 = por %p3743_p12, %p3742_p0 }
  0x57   : > { %p3745_p4 = pnand %p3744_p2, %p3740_p13 }
  0x59   : > { %3748 = shalt.err (!%p3745_p4)
}
  0x5a   : > { %s3749_s15 = scalar_lea.vmem %s266_s30, 128  ;;  %s3844_s12 = smov [#allocation2]  }
  0x5b   : > { %p3750_p1 = scmp.ne.s32.totalorder %s266_s30, %s3749_s15  ;;  %s3754_s29 = sshll.u32 %s3844_s12, 4  ;;  %s3755_s29 = int_to_ptr.vmem [resolvable:$false] %s3754_s29 }
  0x5c   : > { %s3756_s1 = scalar_lea.vmem %s3755_s29, 256  ;;  %p3757_p9 = scmp.lt.s32.totalorder %s266_s30, %s3755_s29 }
  0x5d   : > { %p3752_p8 = pnand %p3750_p1, %p3738_p10  ;;  %p3758_p11 = scmp.lt.s32.totalorder %s3756_s1, %s3749_s15 }
  0x5f   : > { %p3753_p5 = pneg %p3752_p8  ;;  %p3759_p6 = por %p3758_p11, %p3757_p9 }
  0x61   : > { %p3760_p3 = pnand %p3759_p6, %p3753_p5 }
  0x63   : > { %3763 = shalt.err (!%p3760_p3)
}
  0x64   : > { %3529 = dma.hbm_to_vmem [thread:$0]  (!%p4042_p7), %s4038_s26, 128, %s266_s30, %s255_s7  }
  0x65   : > { %p4509_p13 = scmp.ne.s32.totalorder %s4501_s28, 0 }
  0x66   : > { %s4063_s10 = sand.u32 (!%p4509_p13), 1, %s3828_s22   ;;  %p4510_p1 = scmp.ne.s32.totalorder (!%p4509_p13), %s4505_s11, 0 }
  0x67   : > { %274 = sbr.rel (%p4509_p13) target bundleno = 1594 (0x63a), region = 44  ;;  %s3246_s13 = sshll.u32 (!%p4509_p13), %s4063_s10, 3 }
  0x68   : > { %s277_s19 = scalar_lea.sflag (!%p4509_p13), [#allocation3], %s4063_s10  ;;  %s4069_s1 = scalar_lea.vmem (!%p4509_p13), [#allocation2], %s3246_s13 }
  0x6c   : > { %3807 = dma.done.wait (%p4510_p1), %s277_s19, 128  }
  0x6d   : > { %3809 = vsyncadd (%p4510_p1), %s277_s19, 4294967168  ;;  %p4511_p3 = scmp.eq.s32.totalorder %s3920_s27, 0 }
  0x6f   : > { %3811 = dma.done.wait (%p4511_p3), [#allocation6], 1024   ;;  %p4512_p4 = pmov %p4511_p3 }
  0x70   : > { %p4513_p6 = pmov %p4511_p3 }
  0x71   : > { %3813 = vsyncadd (%p4512_p4), [#allocation6], 4294966272 }
  0x72   : > { %3815 = dma.done.wait (%p4513_p6), [#allocation9], 1024   ;;  %p4514_p5 = pmov %p4511_p3 }
  0x73   : > { %v3845_v0 = vmov 0.0   ;;  %vm3846_vm0 = vmmov 0   ;;  %v329_v1 = vld [vmem:[#allocation5 + $0x18] sm:$0xff]  ;;  %v328_v3 = vld [vmem:[#allocation5 + $0x10] sm:$0xff]  ;;  %v327_v5 = vld [vmem:[#allocation5 + $0x8] sm:$0xff]  ;;  %vm330_vm1 = vcmask 261120   ;;  %v580_v23 = vlaneseq }
  0x74   : > { %3817 = vsyncadd (%p4514_p5), [#allocation9], 4294966272  ;;  %3369 = vmatprep.subr.mxu0 %v3845_v0  ;;  %3380 = vmatprep.subr.mxu1 %v3845_v0  ;;  %v408_v2 = vld [vmem:[#allocation7 + $0x18] sm:$0xff]  ;;  %v407_v4 = vld [vmem:[#allocation7 + $0x10] sm:$0xff]  ;;  %s3847_s28 = smov 116   ;;  %s3848_s11 = smov 124  }
  0x75   : > { %3377 = vmatprep.mubr.msk.f32.mxu0 %vm3846_vm0, %v3845_v0  ;;  %3388 = vmatprep.mubr.msk.f32.mxu1 %vm3846_vm0, %v3845_v0  ;;  %v406_v6 = vld [vmem:[#allocation7 + $0x8] sm:$0xff]  ;;  %v326_v7 = vld [vmem:[#allocation5] sm:$0xff]  ;;  %v325_v9 = vld [vmem:[%s4069_s1] sm:$0xff]  ;;  %s3849_s26 = smov 120   ;;  %s3850_s30 = smov 112   ;;  %v581_v27 = vshrl.u32 %v580_v23, 7 }
  0x76   : > { %3370 = vmatpush3.msra.mxu0 %v329_v1  ;;  %3381 = vmatpush3.msra.mxu1 %v408_v2  ;;  %v405_v8 = vld [vmem:[#allocation7] sm:$0xff]  ;;  %v482_v10 = vld [vmem:[#allocation8 + $0x18] sm:$0xff]  ;;  %v481_v11 = vld [vmem:[#allocation8 + $0x10] sm:$0xff]  ;;  %s3851_s8 = smov 108   ;;  %s3852_s7 = smov 104   ;;  %vm1435_vm2 = vcmask 31744  }
  0x77   : > { %3371 = vmatprep.subr.mxu0 %v3845_v0  ;;  %3382 = vmatprep.subr.mxu1 %v3845_v0  ;;  %v480_v12 = vld [vmem:[#allocation8 + $0x8] sm:$0xff]  ;;  %v479_v13 = vld [vmem:[#allocation8] sm:$0xff]  ;;  %s3853_s20 = smov 100   ;;  %v3854_v21 = vmov 1983009808   ;;  %vm2044_vm3 = vcmask 64512  }
  0x78   : > { %3372 = vmatpush3.msra.mxu0 %v328_v3  ;;  %3383 = vmatpush3.msra.mxu1 %v407_v4  ;;  %v578_v22 = vunpack.c.l.s4 %v3854_v21  ;;  %v3855_v24 = vmov 1934713408   ;;  %s3856_s18 = smov 8   ;;  %s3857_s25 = smov 4   ;;  %vm3019_vm4 = vcmask 97280   ;;  %vm3021_vm5 = vcmask 130048  }
  0x79   : > { %3373 = vmatprep.subr.mxu0 %v3845_v0  ;;  %3384 = vmatprep.subr.mxu1 %v3845_v0  ;;  %v642_v25 = vunpack.c.l.s4 %v3855_v24  ;;  %s3858_s15 = smov 12   ;;  %s3859_s12 = smov 20   ;;  %vm3023_vm6 = vcmask 162816   ;;  %vm3025_vm7 = vcmask 195584   ;;  %vm3027_vm8 = vcmask 228352  }
  0x7a   : > { %3374 = vmatpush3.msra.mxu0 %v327_v5  ;;  %3385 = vmatpush3.msra.mxu1 %v406_v6  ;;  %v579_v26 = vunpack.c.0.s8 %v578_v22  ;;  %s3860_s29 = smov 16   ;;  %s3861_s19 = smov 28  }
  0x7b   : > { %3375 = vmatprep.subr.mxu0 %v3845_v0  ;;  %3386 = vmatprep.subr.mxu1 %v3845_v0  ;;  %v643_v30 = vunpack.c.0.s8 %v642_v25  ;;  %s3862_s1 = smov 24   ;;  %p4515_p7 = scmp.ne.s32.totalorder %s4506_s16, 0 }
  0x7c   : > { %3376 = vmatpush3.msra.mxu0 %v326_v7  ;;  %3387 = vmatpush3.msra.mxu1 %v405_v8  ;;  %v4134_v31 = vsub.s32 %v579_v26, %v581_v27 }
  0x7d   : > { %3378 = vmatmul.mubr.msk.f32.vlgmr.msra.gmra.mxu0 %vm330_vm1, %v325_v9  ;;  %3389 = vmatmul.mubr.msk.f32.vlgmr.msra.gmra.mxu1 %vm330_vm1, %v325_v9  ;;  %v4136_v38 = vsub.s32 %v643_v30, %v581_v27 }
  0x7e   : > { %3391 = vmatprep.subr.mxu0 %v3845_v0  ;;  %3399 = vmatprep.mubr.msk.f32.mxu0 %vm3846_vm0, %v3845_v0 }
  0x7f   : > { %3402 = vmatprep.subr.mxu1 %v3845_v0  ;;  %3404 = vmatprep.mubr.msk.f32.mxu1 %vm3846_vm0, %v3845_v0 }
  0x80   : > { %3392 = vmatpush3.msra.mxu0 %v482_v10 }
  0x81   : > { %3393 = vmatprep.subr.mxu0 %v3845_v0 }
  0x82   : > { %3394 = vmatpush3.msra.mxu0 %v481_v11 }
  0x83   : > { %3395 = vmatprep.subr.mxu0 %v3845_v0 }
  0x84   : > { %3396 = vmatpush3.msra.mxu0 %v480_v12 }
  0x85   : > { %3397 = vmatprep.subr.mxu0 %v3845_v0 }
  0x86   : > { %3398 = vmatpush3.msra.mxu0 %v479_v13 }
  0x87   : > { %3400 = vmatmul.mubr.msk.f32.vlgmr.msra.gmra.mxu0 %vm330_vm1, %v325_v9  ;;  %3422 = vmatprep.subr.mxu0 %v3845_v0 }
  0x88   : > { %3424 = vmatprep.mubr.msk.f32.mxu0 %vm3846_vm0, %v3845_v0 }
 0x13d   : > { %v400_v14 = vpop.f32.mrf.mxu0  ;;  %v475_v15 = vpop.f32.mrf.mxu1 }
 0x13e   : > { %v4111_v16 = vmul.f32 0.5, %v400_v14  ;;  %854 = vrot.lane.b32.xlu1 %v475_v15, %s3847_s28  ;;  %848 = vrot.lane.b32.xlu0 %v475_v15, %s3848_s11 }
 0x13f   : > { %v3379_v17 = vpop.f32.mrf.mxu0  ;;  %v3390_v18 = vpop.f32.mrf.mxu1 }
 0x142   : > { %851 = vrot.lane.b32.xlu0 %v475_v15, %s3849_s26  ;;  %554 = vrot.lane.b32.xlu1 %v4111_v16, %s3848_s11 }
 0x146   : > { %557 = vrot.lane.b32.xlu0 %v4111_v16, %s3849_s26  ;;  %560 = vrot.lane.b32.xlu1 %v4111_v16, %s3847_s28 }
 0x147   : > { %v4130_v19 = vpop.f32.mrf.mxu0 }
 0x149   : > { %v3401_v20 = vpop.f32.mrf.mxu0 }
 0x14a   : > { %857 = vrot.lane.b32.xlu0 %v475_v15, %s3850_s30  ;;  %860 = vrot.lane.b32.xlu1 %v475_v15, %s3851_s8 }
 0x14e   : > { %863 = vrot.lane.b32.xlu0 %v475_v15, %s3852_s7  ;;  %866 = vrot.lane.b32.xlu1 %v475_v15, %s3853_s20 }
 0x152   : > { %563 = vrot.lane.b32.xlu0 %v4111_v16, %s3850_s30  ;;  %566 = vrot.lane.b32.xlu1 %v4111_v16, %s3851_s8 }
 0x156   : > { %569 = vrot.lane.b32.xlu0 %v4111_v16, %s3852_s7  ;;  %572 = vrot.lane.b32.xlu1 %v4111_v16, %s3853_s20 }
 0x15a   : > { %1145 = vrot.lane.b32.xlu0 %v4130_v19, %s3849_s26  ;;  %1142 = vrot.lane.b32.xlu1 %v4130_v19, %s3848_s11  ;;  %s3314_s26 = sshll.u32 %s3920_s27, 7  ;;  %s3863_s27 = smov [#allocation11]  }
 0x1b0   : > { %v855_v28 = vpop.permute.xlu1 %854  ;;  %v849_v29 = vpop.permute.xlu0 %848 }
 0x1b1   : > { %v885_v32 = vcombine.low %v849_v29, %v855_v28  ;;  %v886_v33 = vcombine.high %v849_v29, %v855_v28 }
 0x1b3   : > { %v893_v39 = vrot.slane %v885_v32, %v4134_v31  ;;  %v900_v40 = vrot.slane %v886_v33, %v4134_v31 }
 0x1b4   : > { %v852_v34 = vpop.permute.xlu0 %851  ;;  %v555_v35 = vpop.permute.xlu1 %554 }
 0x1b5   : > { %v869_v36 = vcombine.low %v475_v15, %v852_v34  ;;  %v870_v37 = vcombine.high %v475_v15, %v852_v34 }
 0x1b7   : > { %v877_v41 = vrot.slane %v869_v36, %v4134_v31  ;;  %v884_v42 = vrot.slane %v870_v37, %v4134_v31 }
 0x1b8   : > { %v558_v43 = vpop.permute.xlu0 %557  ;;  %v561_v44 = vpop.permute.xlu1 %560 }
 0x1b9   : > { %v933_v45 = vcombine.low %v877_v41, %v893_v39  ;;  %v934_v46 = vcombine.high %v877_v41, %v893_v39  ;;  %v949_v47 = vcombine.low %v884_v42, %v900_v40  ;;  %v950_v48 = vcombine.high %v884_v42, %v900_v40 }
 0x1ba   : > { %v575_v49 = vcombine.low %v4111_v16, %v558_v43  ;;  %v576_v50 = vcombine.high %v4111_v16, %v558_v43  ;;  %v591_v51 = vcombine.low %v555_v35, %v561_v44  ;;  %v592_v52 = vcombine.high %v555_v35, %v561_v44 }
 0x1bb   : > { %v941_v53 = vrot.slane %v933_v45, %v4136_v38  ;;  %v948_v54 = vrot.slane %v934_v46, %v4136_v38  ;;  %v957_v55 = vrot.slane %v949_v47, %v4136_v38  ;;  %v964_v56 = vrot.slane %v950_v48, %v4136_v38 }
 0x1bc   : > { %v583_v57 = vrot.slane %v575_v49, %v4134_v31  ;;  %v590_v58 = vrot.slane %v576_v50, %v4134_v31  ;;  %v599_v59 = vrot.slane %v591_v51, %v4134_v31  ;;  %v606_v60 = vrot.slane %v592_v52, %v4134_v31  ;;  %v858_v61 = vpop.permute.xlu0 %857  ;;  %v861_v62 = vpop.permute.xlu1 %860 }
 0x1bd   : > { %v3263_v63 = vcombine.low %v941_v53, %v948_v54  ;;  %v3265_v1 = vcombine.high %v941_v53, %v948_v54  ;;  %v3267_v2 = vcombine.low %v957_v55, %v964_v56  ;;  %v3269_v3 = vcombine.high %v957_v55, %v964_v56 }
 0x1be   : > { %v639_v4 = vcombine.low %v583_v57, %v599_v59  ;;  %v640_v5 = vcombine.high %v583_v57, %v599_v59  ;;  %v655_v6 = vcombine.low %v590_v58, %v606_v60  ;;  %v656_v7 = vcombine.high %v590_v58, %v606_v60 }
 0x1bf   : > { %v4153_v8 = vrot.slane %v3263_v63, %v4134_v31  ;;  %v4156_v9 = vrot.slane %v3265_v1, %v4134_v31  ;;  %v4159_v10 = vrot.slane %v3267_v2, %v4134_v31  ;;  %v4162_v11 = vrot.slane %v3269_v3, %v4134_v31 }
 0x1c0   : > { %v647_v12 = vrot.slane %v639_v4, %v4136_v38  ;;  %v654_v13 = vrot.slane %v640_v5, %v4136_v38  ;;  %v663_v14 = vrot.slane %v655_v6, %v4136_v38  ;;  %v670_v15 = vrot.slane %v656_v7, %v4136_v38  ;;  %v864_v16 = vpop.permute.xlu0 %863  ;;  %v867_v17 = vpop.permute.xlu1 %866 }
 0x1c1   : > { %v1069_v18 = vcombine.low %v4153_v8, %v4156_v9  ;;  %v1101_v20 = vcombine.low %v4159_v10, %v4162_v11  ;;  %v901_v25 = vcombine.low %v858_v61, %v864_v16  ;;  %v902_v26 = vcombine.high %v858_v61, %v864_v16 }
 0x1c2   : > { %v3255_v21 = vcombine.low %v647_v12, %v654_v13  ;;  %v3257_v22 = vcombine.high %v647_v12, %v654_v13  ;;  %v3259_v23 = vcombine.low %v663_v14, %v670_v15  ;;  %v3261_v24 = vcombine.high %v663_v14, %v670_v15 }
 0x1c3   : > { %v917_v27 = vcombine.low %v861_v62, %v867_v17  ;;  %v918_v28 = vcombine.high %v861_v62, %v867_v17  ;;  %v909_v36 = vrot.slane %v901_v25, %v4134_v31  ;;  %v916_v37 = vrot.slane %v902_v26, %v4134_v31 }
 0x1c4   : > { %v4173_v29 = vrot.slane %v3255_v21, %v4134_v31  ;;  %v4176_v30 = vrot.slane %v3257_v22, %v4134_v31  ;;  %v4179_v32 = vrot.slane %v3259_v23, %v4134_v31  ;;  %v4182_v33 = vrot.slane %v3261_v24, %v4134_v31  ;;  %v564_v34 = vpop.permute.xlu0 %563  ;;  %v567_v35 = vpop.permute.xlu1 %566 }
 0x1c5   : > { %v925_v39 = vrot.slane %v917_v27, %v4134_v31  ;;  %v932_v40 = vrot.slane %v918_v28, %v4134_v31  ;;  %v1070_v41 = vcombine.high %v4153_v8, %v4156_v9  ;;  %v1102_v42 = vcombine.high %v4159_v10, %v4162_v11 }
 0x1c6   : > { %v775_v43 = vcombine.low %v4173_v29, %v4176_v30  ;;  %v807_v44 = vcombine.low %v4179_v32, %v4182_v33  ;;  %v1077_v49 = vrot.slane %v1069_v18, %v4136_v38  ;;  %v1109_v50 = vrot.slane %v1101_v20, %v4136_v38 }
 0x1c7   : > { %v965_v45 = vcombine.low %v909_v36, %v925_v39  ;;  %v966_v46 = vcombine.high %v909_v36, %v925_v39  ;;  %v981_v47 = vcombine.low %v916_v37, %v932_v40  ;;  %v982_v48 = vcombine.high %v916_v37, %v932_v40 }
 0x1c8   : > { %v570_v51 = vpop.permute.xlu0 %569  ;;  %v573_v52 = vpop.permute.xlu1 %572  ;;  %v4199_v53 = vrot.slane %v775_v43, %v4136_v38  ;;  %v815_v54 = vrot.slane %v807_v44, %v4136_v38  ;;  %v1133_v59 = vcombine.low %v1077_v49, %v1109_v50  ;;  %v776_v16 = vcombine.high %v4173_v29, %v4176_v30 }
 0x1c9   : > { %v973_v55 = vrot.slane %v965_v45, %v4136_v38  ;;  %v980_v56 = vrot.slane %v966_v46, %v4136_v38  ;;  %v989_v57 = vrot.slane %v981_v47, %v4136_v38  ;;  %v996_v58 = vrot.slane %v982_v48, %v4136_v38 }
 0x1ca   : > { %v607_v60 = vcombine.low %v564_v34, %v570_v51  ;;  %v608_v61 = vcombine.high %v564_v34, %v570_v51  ;;  %v623_v62 = vcombine.low %v567_v35, %v573_v52  ;;  %3403 = vmatpush3.xpose.msk.msra.mxu1 %vm1435_vm2, %v1133_v59  ;;  %v624_v6 = vcombine.high %v567_v35, %v573_v52 }
 0x1cb   : > { %v3264_v63 = vcombine.low %v973_v55, %v980_v56  ;;  %v3266_v1 = vcombine.high %v973_v55, %v980_v56  ;;  %v3268_v2 = vcombine.low %v989_v57, %v996_v58  ;;  %v3270_v3 = vcombine.high %v989_v57, %v996_v58  ;;  %3407 = vmatprep.subr.mxu1 %v3845_v0 }
 0x1cc   : > { %v615_v4 = vrot.slane %v607_v60, %v4134_v31  ;;  %v622_v5 = vrot.slane %v608_v61, %v4134_v31  ;;  %v631_v7 = vrot.slane %v623_v62, %v4134_v31  ;;  %v638_v12 = vrot.slane %v624_v6, %v4134_v31 }
 0x1cd   : > { %v1020_v8 = vrot.slane %v3264_v63, %v4134_v31  ;;  %v1036_v9 = vrot.slane %v3266_v1, %v4134_v31  ;;  %v1052_v10 = vrot.slane %v3268_v2, %v4134_v31  ;;  %v1068_v11 = vrot.slane %v3270_v3, %v4134_v31 }
 0x1ce   : > { %v671_v13 = vcombine.low %v615_v4, %v631_v7  ;;  %v672_v14 = vcombine.high %v615_v4, %v631_v7  ;;  %v839_v15 = vcombine.low %v4199_v53, %v815_v54  ;;  %v808_v17 = vcombine.high %v4179_v32, %v4182_v33 }
 0x1cf   : > { %v1085_v18 = vcombine.low %v1020_v8, %v1036_v9  ;;  %v687_v22 = vcombine.low %v622_v5, %v638_v12  ;;  %v688_v23 = vcombine.high %v622_v5, %v638_v12  ;;  %v1117_v24 = vcombine.low %v1052_v10, %v1068_v11 }
 0x1d0   : > { %v679_v20 = vrot.slane %v671_v13, %v4136_v38  ;;  %v686_v21 = vrot.slane %v672_v14, %v4136_v38  ;;  %3405 = vmatmul.mubr.msk.f32.vlgmr.msra.gmra.mxu1 %vm1435_vm2, %v839_v15  ;;  %v1134_v25 = vcombine.high %v1077_v49, %v1109_v50  ;;  %v1084_v26 = vrot.slane %v1070_v41, %v4136_v38 }
 0x1d1   : > { %3409 = vmatprep.mubr.msk.f32.mxu1 %vm3846_vm0, %v3845_v0  ;;  %v1116_v27 = vrot.slane %v1102_v42, %v4136_v38  ;;  %v695_v28 = vrot.slane %v687_v22, %v4136_v38  ;;  %v702_v29 = vrot.slane %v688_v23, %v4136_v38  ;;  %v840_v33 = vcombine.high %v4199_v53, %v815_v54 }
 0x1d2   : > { %v3256_v30 = vcombine.low %v679_v20, %v686_v21  ;;  %v3258_v32 = vcombine.high %v679_v20, %v686_v21  ;;  %3408 = vmatpush3.xpose.msk.msra.mxu1 %vm1435_vm2, %v1134_v25  ;;  %v790_v34 = vrot.slane %v776_v16, %v4136_v38  ;;  %v822_v35 = vrot.slane %v808_v17, %v4136_v38 }
 0x1d3   : > { %v3260_v39 = vcombine.low %v695_v28, %v702_v29  ;;  %v3262_v40 = vcombine.high %v695_v28, %v702_v29  ;;  %3412 = vmatprep.subr.mxu1 %v3845_v0  ;;  %v1086_v41 = vcombine.high %v1020_v8, %v1036_v9  ;;  %v1135_v42 = vcombine.low %v1084_v26, %v1116_v27 }
 0x1d4   : > { %v726_v36 = vrot.slane %v3256_v30, %v4134_v31  ;;  %v742_v37 = vrot.slane %v3258_v32, %v4134_v31  ;;  %v1093_v43 = vrot.slane %v1085_v18, %v4136_v38  ;;  %v1125_v44 = vrot.slane %v1117_v24, %v4136_v38  ;;  %v1146_v32 = vpop.permute.xlu0 %1145 }
 0x1d5   : > { %v1118_v45 = vcombine.high %v1052_v10, %v1068_v11  ;;  %v758_v46 = vrot.slane %v3260_v39, %v4134_v31  ;;  %v774_v47 = vrot.slane %v3262_v40, %v4134_v31  ;;  %3410 = vmatmul.mubr.msk.f32.vlgmr.msra.gmra.mxu1 %vm1435_vm2, %v840_v33  ;;  %v841_v51 = vcombine.low %v790_v34, %v822_v35 }
 0x1d6   : > { %v791_v48 = vcombine.low %v726_v36, %v742_v37  ;;  %3413 = vmatpush3.xpose.msk.msra.mxu1 %vm1435_vm2, %v1135_v42  ;;  %3414 = vmatprep.mubr.msk.f32.mxu1 %vm3846_vm0, %v3845_v0  ;;  %v1137_v49 = vcombine.low %v1093_v43, %v1125_v44  ;;  %v792_v53 = vcombine.high %v726_v36, %v742_v37  ;;  %v1143_v36 = vpop.permute.xlu1 %1142 }
 0x1d7   : > { %v823_v50 = vcombine.low %v758_v46, %v774_v47  ;;  %3417 = vmatprep.subr.mxu1 %v3845_v0  ;;  %v1136_v54 = vcombine.high %v1084_v26, %v1116_v27  ;;  %v1100_v55 = vrot.slane %v1086_v41, %v4136_v38  ;;  %v824_v56 = vcombine.high %v758_v46, %v774_v47 }
 0x1d8   : > { %v799_v52 = vrot.slane %v791_v48, %v4136_v38  ;;  %3423 = vmatpush3.xpose.msk.msra.mxu0 %vm1435_vm2, %v1137_v49  ;;  %v1132_v58 = vrot.slane %v1118_v45, %v4136_v38  ;;  %v842_v59 = vcombine.high %v790_v34, %v822_v35  ;;  %v1138_v61 = vcombine.high %v1093_v43, %v1125_v44 }
 0x1d9   : > { %3415 = vmatmul.mubr.msk.f32.vlgmr.msra.gmra.mxu1 %vm1435_vm2, %v841_v51  ;;  %3432 = vmatprep.subr.mxu0 %v3845_v0  ;;  %v831_v57 = vrot.slane %v823_v50, %v4136_v38  ;;  %v806_v62 = vrot.slane %v792_v53, %v4136_v38  ;;  %v838_v2 = vrot.slane %v824_v56, %v4136_v38 }
 0x1da   : > { %3418 = vmatpush3.xpose.msk.msra.mxu1 %vm1435_vm2, %v1136_v54  ;;  %3419 = vmatprep.mubr.msk.f32.mxu1 %vm3846_vm0, %v3845_v0  ;;  %v1139_v1 = vcombine.low %v1100_v55, %v1132_v58  ;;  %v1140_v3 = vcombine.high %v1100_v55, %v1132_v58  ;;  %v1163_v49 = vcombine.low %v4130_v19, %v1146_v32 }
 0x1db   : > { %3427 = vmatprep.subr.mxu1 %v3845_v0  ;;  %v843_v60 = vcombine.low %v799_v52, %v831_v57  ;;  %v844_v63 = vcombine.high %v799_v52, %v831_v57  ;;  %v845_v4 = vcombine.low %v806_v62, %v838_v2  ;;  %v846_v5 = vcombine.high %v806_v62, %v838_v2 }
 0x1dc   : > { %v1164_v50 = vcombine.high %v4130_v19, %v1146_v32  ;;  %v1171_v58 = vrot.slane %v1163_v49, %v4134_v31 }
 0x1dd   : > { %3420 = vmatmul.mubr.msk.f32.vlgmr.msra.gmra.mxu1 %vm1435_vm2, %v842_v59  ;;  %3425 = vmatmul.mubr.msk.f32.vlgmr.msra.gmra.mxu0 %vm1435_vm2, %v843_v60 }
 0x1de   : > { %3428 = vmatpush3.xpose.msk.msra.mxu1 %vm1435_vm2, %v1138_v61  ;;  %3429 = vmatprep.mubr.msk.f32.mxu1 %vm3846_vm0, %v3845_v0  ;;  %v1178_v59 = vrot.slane %v1164_v50, %v4134_v31 }
 0x1df   : > { %3437 = vmatprep.subr.mxu1 %v3845_v0  ;;  %3433 = vmatpush3.xpose.msk.msra.mxu0 %vm1435_vm2, %v1139_v1 }
 0x1e0   : > { %3434 = vmatprep.mubr.msk.f32.mxu0 %vm3846_vm0, %v3845_v0  ;;  %3442 = vmatprep.subr.mxu0 %v3845_v0 }
 0x1e1   : > { %3430 = vmatmul.mubr.msk.f32.vlgmr.msra.gmra.mxu1 %vm1435_vm2, %v844_v63 }
 0x1e2   : > { %3438 = vmatpush3.xpose.msk.msra.mxu1 %vm1435_vm2, %v1140_v3  ;;  %3439 = vmatprep.mubr.msk.f32.mxu1 %vm3846_vm0, %v3845_v0 }
 0x1e3   : > { %3435 = vmatmul.mubr.msk.f32.vlgmr.msra.gmra.mxu0 %vm1435_vm2, %v845_v4  ;;  %3447 = vmatprep.subr.mxu1 %v3845_v0 }
 0x1e4   : > { %3444 = vmatprep.mubr.msk.f32.mxu0 %vm3846_vm0, %v3845_v0 }
 0x1e5   : > { %3440 = vmatmul.mubr.msk.f32.vlgmr.msra.gmra.mxu1 %vm1435_vm2, %v846_v5 }
 0x1e6   : > { %3449 = vmatprep.mubr.msk.f32.mxu1 %vm3846_vm0, %v3845_v0 }
 0x290   : > { %v1508_v6 = vpop.f32.mrf.mxu1 }
 0x291   : > { %v2045_v7 = vsel %vm2044_vm3, %v1508_v6, -inf }
 0x292   : > { %v3406_v8 = vpop.f32.mrf.mxu1  ;;  %2046 = vmax.xlane.f32.xlu0 %v2045_v7 }
 0x295   : > { %v1584_v9 = vpop.f32.mrf.mxu1 }
 0x296   : > { %v2048_v23 = vsel %vm2044_vm3, %v1584_v9, -inf }
 0x297   : > { %v3411_v10 = vpop.f32.mrf.mxu1 }
 0x299   : > { %v4281_v11 = vpop.f32.mrf.mxu1 }
 0x29a   : > { %v2051_v12 = vsel %vm2044_vm3, %v4281_v11, -inf }
 0x29b   : > { %v3416_v13 = vpop.f32.mrf.mxu1  ;;  %2052 = vmax.xlane.f32.xlu0 %v2051_v12 }
 0x29d   : > { %v1736_v14 = vpop.f32.mrf.mxu1  ;;  %v1812_v15 = vpop.f32.mrf.mxu0 }
 0x29e   : > { %v2054_v16 = vsel %vm2044_vm3, %v1736_v14, -inf  ;;  %v2057_v17 = vsel %vm2044_vm3, %v1812_v15, -inf }
 0x29f   : > { %v3421_v18 = vpop.f32.mrf.mxu1  ;;  %2055 = vmax.xlane.f32.xlu0 %v2054_v16  ;;  %2058 = vmax.xlane.f32.xlu1 %v2057_v17  ;;  %v3426_v20 = vpop.f32.mrf.mxu0 }
 0x2a1   : > { %v1888_v21 = vpop.f32.mrf.mxu1 }
 0x2a2   : > { %v2060_v22 = vsel %vm2044_vm3, %v1888_v21, -inf }
 0x2a3   : > { %v3431_v24 = vpop.f32.mrf.mxu1  ;;  %2061 = vmax.xlane.f32.xlu0 %v2060_v22  ;;  %v4289_v25 = vpop.f32.mrf.mxu0  ;;  %2049 = vmax.xlane.f32.xlu1 %v2048_v23 }
 0x2a4   : > { %v2063_v30 = vsel %vm2044_vm3, %v4289_v25, -inf }
 0x2a5   : > { %v2040_v26 = vpop.f32.mrf.mxu1  ;;  %v3436_v27 = vpop.f32.mrf.mxu0 }
 0x2a6   : > { %v2066_v28 = vsel %vm2044_vm3, %v2040_v26, -inf }
 0x2a7   : > { %v3441_v29 = vpop.f32.mrf.mxu1  ;;  %2067 = vmax.xlane.f32.xlu0 %v2066_v28 }
 0x2b4   : > { %1148 = vrot.lane.b32.xlu1 %v4130_v19, %s3847_s28 }
 0x2bd   : > { %1151 = vrot.lane.b32.xlu0 %v4130_v19, %s3850_s30  ;;  %s324_s30 = scalar_lea.vmem [#allocation11], %s3246_s13  ;;  %s3768_s13 = sshll.u32 %s3863_s27, 4  ;;  %s3769_s13 = int_to_ptr.vmem [resolvable:$false] %s3768_s13 }
 0x2d8   : > { %2064 = vmax.xlane.f32.xlu1 %v2063_v30 }
 0x2e9   : > { %1154 = vrot.lane.b32.xlu1 %v4130_v19, %s3851_s8  ;;  %s3128_s8 = sshll.u32 %s324_s30, 4  ;;  %s3129_s8 = int_to_ptr.vmem [resolvable:$true] %s3128_s8 }
 0x2ea   : > { %p3771_p12 = scmp.lt.s32.totalorder %s3129_s8, %s3769_s13 }
 0x31b   : > { %v2047_v33 = vpop.xlane.xlu0 %2046 }
 0x31c   : > { %v2069_v34 = vsub.f32 %v1508_v6, %v2047_v33 }
 0x31e   : > { %v2077_v35 = vmul.f32 1.442695, %v2069_v34 }
 0x320   : > { %3600 = vpow2.f32 %v2077_v35 }
 0x324   : > { %v4300_v37 = vpop.xlane.xlu0 %2052 }
 0x328   : > { %v2056_v39 = vpop.xlane.xlu0 %2055  ;;  %v2059_v40 = vpop.xlane.xlu1 %2058 }
 0x329   : > { %v2073_v41 = vsub.f32 %v1812_v15, %v2059_v40  ;;  %v2072_v44 = vsub.f32 %v1736_v14, %v2056_v39 }
 0x32b   : > { %v2085_v42 = vmul.f32 1.442695, %v2073_v41  ;;  %v2083_v52 = vmul.f32 1.442695, %v2072_v44 }
 0x32c   : > { %v2062_v45 = vpop.xlane.xlu0 %2061  ;;  %v2050_v46 = vpop.xlane.xlu1 %2049 }
 0x32d   : > { %v4302_v43 = vpop.eup %3600  ;;  %v2070_v47 = vsub.f32 %v1584_v9, %v2050_v46  ;;  %3602 = vpow2.f32 %v2085_v42  ;;  %v2074_v53 = vsub.f32 %v1888_v21, %v2062_v45 }
 0x32e   : > { %v2093_v48 = vsel %vm2044_vm3, %v4302_v43, 0.0 }
 0x32f   : > { %2094 = vadd.xlane.f32.xlu1 %v2093_v48  ;;  %v2079_v51 = vmul.f32 1.442695, %v2070_v47  ;;  %v2087_v62 = vmul.f32 1.442695, %v2074_v53  ;;  %v2071_v47 = vsub.f32 %v4281_v11, %v4300_v37 }
 0x330   : > { %v1149_v54 = vpop.permute.xlu1 %1148  ;;  %v2068_v55 = vpop.xlane.xlu0 %2067 }
 0x331   : > { %v1179_v56 = vcombine.low %v1143_v36, %v1149_v54  ;;  %v1180_v57 = vcombine.high %v1143_v36, %v1149_v54  ;;  %3604 = vpow2.f32 %v2079_v51  ;;  %v2076_v63 = vsub.f32 %v2040_v26, %v2068_v55 }
 0x332   : > { %3606 = vpow2.f32 %v2083_v52  ;;  %v2081_v50 = vmul.f32 1.442695, %v2071_v47 }
 0x333   : > { %v1187_v60 = vrot.slane %v1179_v56, %v4134_v31  ;;  %v1194_v61 = vrot.slane %v1180_v57, %v4134_v31  ;;  %3608 = vpow2.f32 %v2087_v62  ;;  %v2091_v8 = vmul.f32 1.442695, %v2076_v63 }
 0x334   : > { %v1152_v56 = vpop.permute.xlu0 %1151 }
 0x335   : > { %v1227_v1 = vcombine.low %v1171_v58, %v1187_v60  ;;  %v1228_v2 = vcombine.high %v1171_v58, %v1187_v60  ;;  %v1243_v3 = vcombine.low %v1178_v59, %v1194_v61  ;;  %v1244_v4 = vcombine.high %v1178_v59, %v1194_v61 }
 0x336   : > { %3610 = vpow2.f32 %v2091_v8 }
 0x337   : > { %v1235_v5 = vrot.slane %v1227_v1, %v4136_v38  ;;  %v1242_v6 = vrot.slane %v1228_v2, %v4136_v38  ;;  %v1251_v7 = vrot.slane %v1243_v3, %v4136_v38  ;;  %v1258_v9 = vrot.slane %v1244_v4, %v4136_v38 }
 0x339   : > { %v3271_v10 = vcombine.low %v1235_v5, %v1242_v6  ;;  %v3273_v12 = vcombine.high %v1235_v5, %v1242_v6  ;;  %v3275_v13 = vcombine.low %v1251_v7, %v1258_v9  ;;  %v3277_v14 = vcombine.high %v1251_v7, %v1258_v9 }
 0x33a   : > { %v4316_v15 = vpop.eup %3602 }
 0x33b   : > { %v1307_v16 = vrot.slane %v3271_v10, %v4134_v31  ;;  %v1323_v17 = vrot.slane %v3273_v12, %v4134_v31  ;;  %v1339_v18 = vrot.slane %v3275_v13, %v4134_v31  ;;  %v1355_v20 = vrot.slane %v3277_v14, %v4134_v31 }
 0x33c   : > { %v2105_v21 = vsel %vm2044_vm3, %v4316_v15, 0.0 }
 0x33d   : > { %2106 = vadd.xlane.f32.xlu1 %v2105_v21  ;;  %v1363_v22 = vcombine.low %v1307_v16, %v1323_v17  ;;  %v1364_v23 = vcombine.high %v1307_v16, %v1323_v17  ;;  %v1395_v24 = vcombine.low %v1339_v18, %v1355_v20  ;;  %v1396_v26 = vcombine.high %v1339_v18, %v1355_v20 }
 0x33e   : > { %v3605_v27 = vpop.eup %3604 }
 0x33f   : > { %v1371_v28 = vrot.slane %v1363_v22, %v4136_v38  ;;  %v1378_v29 = vrot.slane %v1364_v23, %v4136_v38  ;;  %v2096_v30 = vsel %vm2044_vm3, %v3605_v27, 0.0  ;;  %v1403_v32 = vrot.slane %v1395_v24, %v4136_v38  ;;  %v3607_v34 = vpop.eup %3606 }
 0x340   : > { %v1410_v33 = vrot.slane %v1396_v26, %v4136_v38  ;;  %2097 = vadd.xlane.f32.xlu0 %v2096_v30  ;;  %v2102_v41 = vsel %vm2044_vm3, %v3607_v34, 0.0  ;;  %v4330_v42 = vpop.eup %3608 }
 0x341   : > { %v1427_v35 = vcombine.low %v1371_v28, %v1403_v32  ;;  %v1428_v36 = vcombine.high %v1371_v28, %v1403_v32  ;;  %v2108_v44 = vsel %vm2044_vm3, %v4330_v42, 0.0 }
 0x342   : > { %v1429_v39 = vcombine.low %v1378_v29, %v1410_v33  ;;  %v1430_v40 = vcombine.high %v1378_v29, %v1410_v33 }
 0x343   : > { %3443 = vmatpush3.msra.mxu0 %v1427_v35  ;;  %3448 = vmatpush3.msra.mxu1 %v1428_v36  ;;  %v4336_v45 = vpop.eup %3610 }
 0x344   : > { %2103 = vadd.xlane.f32.xlu0 %v2102_v41  ;;  %3452 = vmatprep.subr.mxu0 %v3845_v0  ;;  %v2114_v46 = vsel %vm2044_vm3, %v4336_v45, 0.0 }
 0x345   : > { %3457 = vmatprep.subr.mxu1 %v3845_v0 }
 0x348   : > { %2109 = vadd.xlane.f32.xlu0 %v2108_v44 }
 0x34c   : > { %2115 = vadd.xlane.f32.xlu0 %v2114_v46 }
 0x361   : > { %v2065_v48 = vpop.xlane.xlu1 %2064 }
 0x362   : > { %v2075_v49 = vsub.f32 %v4289_v25, %v2065_v48  ;;  %1160 = vrot.lane.b32.xlu0 %v4130_v19, %s3853_s20 }
 0x364   : > { %v2089_v51 = vmul.f32 1.442695, %v2075_v49 }
 0x365   : > { %v1155_v25 = vpop.permute.xlu1 %1154 }
 0x366   : > { %3612 = vpow2.f32 %v2089_v51 }
 0x367   : > { %3614 = vpow2.f32 %v2081_v50 }
 0x373   : > { %v4345_v52 = vpop.eup %3612 }
 0x374   : > { %v2111_v53 = vsel %vm2044_vm3, %v4345_v52, 0.0  ;;  %v4349_v54 = vpop.eup %3614 }
 0x375   : > { %2112 = vadd.xlane.f32.xlu1 %v2111_v53  ;;  %v2099_v11 = vsel %vm2044_vm3, %v4349_v54, 0.0 }
 0x379   : > { %2100 = vadd.xlane.f32.xlu1 %v2099_v11 }
 0x38a   : > { %1157 = vrot.lane.b32.xlu1 %v4130_v19, %s3852_s7 }
 0x3b8   : > { %v2095_v37 = vpop.xlane.xlu1 %2094 }
 0x3b9   : > { %3616 = vrcp.f32 %v2095_v37 }
 0x3c6   : > { %v3617_v55 = vpop.eup %3616  ;;  %v2107_v63 = vpop.xlane.xlu1 %2106 }
 0x3c7   : > { %v2125_v57 = vmul.f32 %v3617_v55, %v4302_v43 }
 0x3c9   : > { %3445 = vmatmul.mubr.msk.f32.vlgmr.msra.gmra.mxu0 %vm2044_vm3, %v2125_v57  ;;  %v2098_v58 = vpop.xlane.xlu0 %2097 }
 0x3ca   : > { %3453 = vmatpush3.msra.mxu0 %v1429_v39  ;;  %3454 = vmatprep.mubr.msk.f32.mxu0 %vm3846_vm0, %v3845_v0  ;;  %3618 = vrcp.f32 %v2098_v58 }
 0x3cb   : > { %3462 = vmatprep.subr.mxu0 %v3845_v0 }
 0x3cd   : > { %v2104_v59 = vpop.xlane.xlu0 %2103 }
 0x3ce   : > { %3620 = vrcp.f32 %v2104_v59 }
 0x3d1   : > { %v2110_v62 = vpop.xlane.xlu0 %2109 }
 0x3d5   : > { %v2116_v1 = vpop.xlane.xlu0 %2115 }
 0x3d7   : > { %v3619_v19 = vpop.eup %3618 }
 0x3d8   : > { %v2126_v60 = vmul.f32 %v3619_v19, %v3605_v27 }
 0x3d9   : > { %v1161_v3 = vpop.permute.xlu0 %1160 }
 0x3da   : > { %3450 = vmatmul.mubr.msk.f32.vlgmr.msra.gmra.mxu1 %vm2044_vm3, %v2126_v60  ;;  %v1211_v5 = vcombine.low %v1155_v25, %v1161_v3  ;;  %v1212_v6 = vcombine.high %v1155_v25, %v1161_v3 }
 0x3db   : > { %v3621_v61 = vpop.eup %3620  ;;  %3458 = vmatpush3.msra.mxu1 %v1430_v40  ;;  %3459 = vmatprep.mubr.msk.f32.mxu1 %vm3846_vm0, %v3845_v0 }
 0x3dc   : > { %v2128_v43 = vmul.f32 %v3621_v61, %v3607_v34  ;;  %3467 = vmatprep.subr.mxu1 %v3845_v0  ;;  %v1219_v10 = vrot.slane %v1211_v5, %v4134_v31  ;;  %v1226_v12 = vrot.slane %v1212_v6, %v4134_v31 }
 0x3de   : > { %3460 = vmatmul.mubr.msk.f32.vlgmr.msra.gmra.mxu1 %vm2044_vm3, %v2128_v43 }
 0x3df   : > { %3469 = vmatprep.mubr.msk.f32.mxu1 %vm3846_vm0, %v3845_v0 }
 0x3fe   : > { %v2113_v2 = vpop.xlane.xlu1 %2112 }
 0x402   : > { %v2101_v4 = vpop.xlane.xlu1 %2100 }
 0x403   : > { %3622 = vrcp.f32 %v2101_v4 }
 0x404   : > { %3624 = vrcp.f32 %v2107_v63 }
 0x405   : > { %3626 = vrcp.f32 %v2110_v62 }
 0x406   : > { %v1158_v7 = vpop.permute.xlu1 %1157  ;;  %3628 = vrcp.f32 %v2116_v1 }
 0x407   : > { %v1195_v8 = vcombine.low %v1152_v56, %v1158_v7  ;;  %v1196_v9 = vcombine.high %v1152_v56, %v1158_v7  ;;  %3630 = vrcp.f32 %v2113_v2 }
 0x409   : > { %v1203_v13 = vrot.slane %v1195_v8, %v4134_v31  ;;  %v1210_v14 = vrot.slane %v1196_v9, %v4134_v31 }
 0x40b   : > { %v1259_v16 = vcombine.low %v1203_v13, %v1219_v10  ;;  %v1260_v17 = vcombine.high %v1203_v13, %v1219_v10  ;;  %v1275_v18 = vcombine.low %v1210_v14, %v1226_v12  ;;  %v1276_v20 = vcombine.high %v1210_v14, %v1226_v12 }
 0x40d   : > { %v1267_v21 = vrot.slane %v1259_v16, %v4136_v38  ;;  %v1274_v22 = vrot.slane %v1260_v17, %v4136_v38  ;;  %v1283_v23 = vrot.slane %v1275_v18, %v4136_v38  ;;  %v1290_v24 = vrot.slane %v1276_v20, %v4136_v38 }
 0x40f   : > { %v3272_v26 = vcombine.low %v1267_v21, %v1274_v22  ;;  %v3274_v27 = vcombine.high %v1267_v21, %v1274_v22  ;;  %v3276_v28 = vcombine.low %v1283_v23, %v1290_v24  ;;  %v3278_v29 = vcombine.high %v1283_v23, %v1290_v24 }
 0x410   : > { %v3623_v30 = vpop.eup %3622 }
 0x411   : > { %v1314_v32 = vrot.slane %v3272_v26, %v4134_v31  ;;  %v1330_v33 = vrot.slane %v3274_v27, %v4134_v31  ;;  %v1346_v34 = vrot.slane %v3276_v28, %v4134_v31  ;;  %v1362_v35 = vrot.slane %v3278_v29, %v4134_v31  ;;  %v3625_v46 = vpop.eup %3624 }
 0x412   : > { %v2127_v36 = vmul.f32 %v3623_v30, %v4349_v54  ;;  %v3627_v47 = vpop.eup %3626  ;;  %v2129_v55 = vmul.f32 %v3625_v46, %v4316_v15 }
 0x413   : > { %v1379_v39 = vcombine.low %v1314_v32, %v1330_v33  ;;  %v1411_v40 = vcombine.low %v1346_v34, %v1362_v35  ;;  %v1380_v41 = vcombine.high %v1314_v32, %v1330_v33  ;;  %v1412_v44 = vcombine.high %v1346_v34, %v1362_v35  ;;  %v3629_v53 = vpop.eup %3628  ;;  %v3032_v34 = vld [vmem:[#allocation10 + $0x18] sm:$0xff] }
 0x414   : > { %3455 = vmatmul.mubr.msk.f32.vlgmr.msra.gmra.mxu0 %vm2044_vm3, %v2127_v36  ;;  %v2130_v56 = vmul.f32 %v3627_v47, %v4330_v42  ;;  %v3631_v57 = vpop.eup %3630  ;;  %v2132_v59 = vmul.f32 %v3629_v53, %v4336_v45 }
 0x415   : > { %v1387_v48 = vrot.slane %v1379_v39, %v4136_v38  ;;  %v1419_v49 = vrot.slane %v1411_v40, %v4136_v38  ;;  %3464 = vmatprep.mubr.msk.f32.mxu0 %vm3846_vm0, %v3845_v0  ;;  %v1394_v50 = vrot.slane %v1380_v41, %v4136_v38  ;;  %v1426_v51 = vrot.slane %v1412_v44, %v4136_v38 }
 0x416   : > { %v2131_v58 = vmul.f32 %v3631_v57, %v4345_v52 }
 0x417   : > { %v1431_v54 = vcombine.low %v1387_v48, %v1419_v49  ;;  %v1432_v11 = vcombine.high %v1387_v48, %v1419_v49  ;;  %v1433_v25 = vcombine.low %v1394_v50, %v1426_v51  ;;  %v1434_v37 = vcombine.high %v1394_v50, %v1426_v51 }
 0x419   : > { %3463 = vmatpush3.msra.mxu0 %v1431_v54  ;;  %3468 = vmatpush3.msra.mxu1 %v1432_v11 }
 0x41a   : > { %3465 = vmatmul.mubr.msk.f32.vlgmr.msra.gmra.mxu0 %vm2044_vm3, %v2129_v55  ;;  %3470 = vmatmul.mubr.msk.f32.vlgmr.msra.gmra.mxu1 %vm2044_vm3, %v2130_v56 }
 0x41b   : > { %3472 = vmatprep.subr.mxu0 %v3845_v0  ;;  %3477 = vmatprep.subr.mxu1 %v3845_v0 }
 0x41c   : > { %3473 = vmatpush3.msra.mxu0 %v1433_v25  ;;  %3478 = vmatpush3.msra.mxu1 %v1434_v37 }
 0x41d   : > { %3474 = vmatprep.mubr.msk.f32.mxu0 %vm3846_vm0, %v3845_v0  ;;  %3479 = vmatprep.mubr.msk.f32.mxu1 %vm3846_vm0, %v3845_v0 }
 0x41e   : > { %3475 = vmatmul.mubr.msk.f32.vlgmr.msra.gmra.mxu0 %vm2044_vm3, %v2131_v58  ;;  %3480 = vmatmul.mubr.msk.f32.vlgmr.msra.gmra.mxu1 %vm2044_vm3, %v2132_v59 }
 0x41f   : > { %3482 = vmatprep.subr.mxu0 %v3845_v0  ;;  %3490 = vmatprep.mubr.msk.f32.mxu0 %vm3846_vm0, %v3845_v0 }
 0x420   : > { %3483 = vmatpush3.msra.mxu0 %v3032_v34 }
 0x421   : > { %3484 = vmatprep.subr.mxu0 %v3845_v0 }
 0x489   : > { %v2202_v15 = vpop.f32.mrf.mxu0 }
 0x48b   : > { %v3446_v42 = vpop.f32.mrf.mxu0 }
 0x48c   : > { %v3030_v42 = vld [vmem:[#allocation10 + $0x8] sm:$0xff] }
 0x49a   : > { %v2275_v52 = vpop.f32.mrf.mxu1 }
 0x49c   : > { %v3451_v19 = vpop.f32.mrf.mxu1 }
 0x49e   : > { %v2421_v45 = vpop.f32.mrf.mxu1 }
 0x49f   : > { %v2733_v61 = vcombine.low %v2275_v52, %v2421_v45  ;;  %v2734_v43 = vcombine.high %v2275_v52, %v2421_v45 }
 0x4a0   : > { %v3461_v60 = vpop.f32.mrf.mxu1 }
 0x4a1   : > { %v2741_v3 = vrot.slane %v2733_v61, %v4134_v31  ;;  %v2748_v4 = vrot.slane %v2734_v43, %v4134_v31 }
 0x4d4   : > { %v2348_v62 = vpop.f32.mrf.mxu0 }
 0x4d5   : > { %v2717_v63 = vcombine.low %v2202_v15, %v2348_v62  ;;  %v2718_v1 = vcombine.high %v2202_v15, %v2348_v62  ;;  %v3031_v15 = vld [vmem:[#allocation10 + $0x10] sm:$0xff] }
 0x4d6   : > { %v3456_v2 = vpop.f32.mrf.mxu0  ;;  %3485 = vmatpush3.msra.mxu0 %v3031_v15 }
 0x4d7   : > { %v2725_v5 = vrot.slane %v2717_v63, %v4134_v31  ;;  %v2732_v6 = vrot.slane %v2718_v1, %v4134_v31  ;;  %3486 = vmatprep.subr.mxu0 %v3845_v0 }
 0x4d8   : > { %3487 = vmatpush3.msra.mxu0 %v3030_v42 }
 0x4d9   : > { %v2781_v7 = vcombine.low %v2725_v5, %v2741_v3  ;;  %v2782_v8 = vcombine.high %v2725_v5, %v2741_v3  ;;  %v2797_v9 = vcombine.low %v2732_v6, %v2748_v4  ;;  %v2798_v10 = vcombine.high %v2732_v6, %v2748_v4  ;;  %3488 = vmatprep.subr.mxu0 %v3845_v0 }
 0x4da   : > { %v2494_v12 = vpop.f32.mrf.mxu0  ;;  %v2567_v13 = vpop.f32.mrf.mxu1 }
 0x4db   : > { %v2789_v14 = vrot.slane %v2781_v7, %v4136_v38  ;;  %v2796_v16 = vrot.slane %v2782_v8, %v4136_v38  ;;  %v2805_v17 = vrot.slane %v2797_v9, %v4136_v38  ;;  %v2812_v18 = vrot.slane %v2798_v10, %v4136_v38  ;;  %v3029_v8 = vld [vmem:[#allocation10] sm:$0xff] }
 0x4dc   : > { %v3466_v20 = vpop.f32.mrf.mxu0  ;;  %v3471_v21 = vpop.f32.mrf.mxu1  ;;  %3489 = vmatpush3.msra.mxu0 %v3029_v8 }
 0x4dd   : > { %v3303_v22 = vcombine.low %v2789_v14, %v2796_v16  ;;  %v3305_v23 = vcombine.high %v2789_v14, %v2796_v16  ;;  %v3307_v24 = vcombine.low %v2805_v17, %v2812_v18  ;;  %v3309_v26 = vcombine.high %v2805_v17, %v2812_v18 }
 0x4de   : > { %v2640_v27 = vpop.f32.mrf.mxu0  ;;  %v2713_v28 = vpop.f32.mrf.mxu1 }
 0x4df   : > { %v2749_v29 = vcombine.low %v2494_v12, %v2640_v27  ;;  %v2750_v30 = vcombine.high %v2494_v12, %v2640_v27  ;;  %v2765_v32 = vcombine.low %v2567_v13, %v2713_v28  ;;  %v2766_v33 = vcombine.high %v2567_v13, %v2713_v28 }
 0x4e0   : > { %v3476_v35 = vpop.f32.mrf.mxu0  ;;  %v3481_v36 = vpop.f32.mrf.mxu1  ;;  %v2861_v39 = vrot.slane %v3303_v22, %v4134_v31  ;;  %v2877_v40 = vrot.slane %v3305_v23, %v4134_v31  ;;  %v2893_v41 = vrot.slane %v3307_v24, %v4134_v31  ;;  %v2909_v44 = vrot.slane %v3309_v26, %v4134_v31 }
 0x4e1   : > { %v2757_v46 = vrot.slane %v2749_v29, %v4134_v31  ;;  %v2764_v47 = vrot.slane %v2750_v30, %v4134_v31  ;;  %v2773_v48 = vrot.slane %v2765_v32, %v4134_v31  ;;  %v2780_v49 = vrot.slane %v2766_v33, %v4134_v31 }
 0x4e2   : > { %v2918_v50 = vcombine.high %v2861_v39, %v2877_v40  ;;  %v2950_v51 = vcombine.high %v2893_v41, %v2909_v44  ;;  %v2917_v53 = vcombine.low %v2861_v39, %v2877_v40  ;;  %v2949_v54 = vcombine.low %v2893_v41, %v2909_v44  ;;  %v3311_v40 = vld [vmem:[%s4494_s5] ss:$0 sm:$0xff] }
 0x4e3   : > { %v2813_v11 = vcombine.low %v2757_v46, %v2773_v48  ;;  %v2814_v25 = vcombine.high %v2757_v46, %v2773_v48  ;;  %v2829_v37 = vcombine.low %v2764_v47, %v2780_v49  ;;  %v2830_v55 = vcombine.high %v2764_v47, %v2780_v49 }
 0x4e4   : > { %v2932_v56 = vrot.slane %v2918_v50, %v4136_v38  ;;  %v2964_v57 = vrot.slane %v2950_v51, %v4136_v38  ;;  %v2925_v58 = vrot.slane %v2917_v53, %v4136_v38  ;;  %v2957_v59 = vrot.slane %v2949_v54, %v4136_v38 }
 0x4e5   : > { %v2821_v52 = vrot.slane %v2813_v11, %v4136_v38  ;;  %v2828_v19 = vrot.slane %v2814_v25, %v4136_v38  ;;  %v2837_v45 = vrot.slane %v2829_v37, %v4136_v38  ;;  %v2844_v60 = vrot.slane %v2830_v55, %v4136_v38 }
 0x4e6   : > { %v2983_v61 = vcombine.low %v2932_v56, %v2964_v57  ;;  %v2982_v43 = vcombine.high %v2925_v58, %v2957_v59  ;;  %v2981_v62 = vcombine.low %v2925_v58, %v2957_v59  ;;  %v2984_v9 = vcombine.high %v2932_v56, %v2964_v57 }
 0x4e7   : > { %v3304_v63 = vcombine.low %v2821_v52, %v2828_v19  ;;  %v3306_v1 = vcombine.high %v2821_v52, %v2828_v19  ;;  %v3308_v2 = vcombine.low %v2837_v45, %v2844_v60  ;;  %v3310_v3 = vcombine.high %v2837_v45, %v2844_v60 }
 0x4e8   : > { %2994 = vrot.lane.b32.xlu0 %v2983_v61, %s3856_s18  ;;  %2990 = vrot.lane.b32.xlu1 %v2982_v43, %s3857_s25  ;;  %s4451_s18 = scalar_lea.hbm %s4495_s6, %s3314_s26  ;;  %s3115_s25 = scalar_lea.sflag [#allocation4], %s4063_s10 }
 0x4e9   : > { %v2868_v4 = vrot.slane %v3304_v63, %v4134_v31  ;;  %v2884_v5 = vrot.slane %v3306_v1, %v4134_v31  ;;  %v2900_v6 = vrot.slane %v3308_v2, %v4134_v31  ;;  %v2916_v7 = vrot.slane %v3310_v3, %v4134_v31 }
 0x4eb   : > { %v2933_v10 = vcombine.low %v2868_v4, %v2884_v5  ;;  %v2965_v12 = vcombine.low %v2900_v6, %v2916_v7  ;;  %v2934_v13 = vcombine.high %v2868_v4, %v2884_v5  ;;  %v2966_v14 = vcombine.high %v2900_v6, %v2916_v7 }
 0x4ec   : > { %2998 = vrot.lane.b32.xlu1 %v2984_v9, %s3858_s15  ;;  %s3764_s15 = scalar_lea.vmem %s3129_s8, 128 }
 0x4ed   : > { %v2941_v16 = vrot.slane %v2933_v10, %v4136_v38  ;;  %v2973_v17 = vrot.slane %v2965_v12, %v4136_v38  ;;  %v2948_v21 = vrot.slane %v2934_v13, %v4136_v38  ;;  %v2980_v31 = vrot.slane %v2966_v14, %v4136_v38  ;;  %p3765_p8 = scmp.ne.s32.totalorder %s3129_s8, %s3764_s15 }
 0x4ef   : > { %v2986_v18 = vcombine.high %v2941_v16, %v2973_v17  ;;  %v2985_v20 = vcombine.low %v2941_v16, %v2973_v17  ;;  %v2988_v0 = vcombine.high %v2948_v21, %v2980_v31  ;;  %v2987_v22 = vcombine.low %v2948_v21, %v2980_v31  ;;  %p3766_p10 = pnand %p3765_p8, %p4515_p7 }
 0x4f1   : > { %3006 = vrot.lane.b32.xlu1 %v2986_v18, %s3859_s12  ;;  %3002 = vrot.lane.b32.xlu0 %v2985_v20, %s3860_s29  ;;  %p3767_p0 = pneg %p3766_p10  ;;  %s3770_s12 = scalar_lea.vmem %s3769_s13, 256 }
 0x4f2   : > { %p3772_p2 = scmp.lt.s32.totalorder %s3770_s12, %s3764_s15 }
 0x4f4   : > { %p3773_p9 = por %p3772_p2, %p3771_p12 }
 0x4f5   : > { %3014 = vrot.lane.b32.xlu1 %v2988_v0, %s3861_s19  ;;  %3010 = vrot.lane.b32.xlu0 %v2987_v22, %s3862_s1 }
 0x4f6   : > { %p3774_p11 = pnand %p3773_p9, %p3767_p0 }
 0x55a   : > { %v2991_v23 = vpop.permute.xlu1 %2990  ;;  %v2995_v24 = vpop.permute.xlu0 %2994 }
 0x55b   : > { %v3017_v26 = vsel %vm1435_vm2, %v2981_v62, %v2991_v23 }
 0x55c   : > { %v3018_v38 = vsel %vm2044_vm3, %v3017_v26, %v2995_v24 }
 0x55e   : > { %v2999_v27 = vpop.permute.xlu1 %2998 }
 0x55f   : > { %v3020_v28 = vsel %vm3019_vm4, %v3018_v38, %v2999_v27 }
 0x563   : > { %v3007_v29 = vpop.permute.xlu1 %3006  ;;  %v3003_v30 = vpop.permute.xlu0 %3002 }
 0x564   : > { %v3022_v32 = vsel %vm3021_vm5, %v3020_v28, %v3003_v30 }
 0x565   : > { %v3024_v34 = vsel %vm3023_vm6, %v3022_v32, %v3007_v29 }
 0x567   : > { %v3015_v33 = vpop.permute.xlu1 %3014  ;;  %v3011_v35 = vpop.permute.xlu0 %3010 }
 0x568   : > { %v3026_v36 = vsel %vm3025_vm7, %v3024_v34, %v3011_v35 }
 0x569   : > { %v3028_v39 = vsel %vm3027_vm8, %v3026_v36, %v3015_v33 }
 0x56a   : > { %3491 = vmatmul.mubr.msk.f32.vlgmr.msra.gmra.mxu0 %vm330_vm1, %v3028_v39 }
 0x62a   : > { %v3109_v41 = vpop.f32.mrf.mxu0 }
 0x62b   : > { %v3110_v44 = vadd.f32 %v3311_v40, %v3109_v41 }
 0x62c   : > { %v3492_v46 = vpop.f32.mrf.mxu0 }
 0x62d   : > { %3113 = vst.msk [vmem:[%s324_s30] sm:$0xff] %vm330_vm1, %v3110_v44 }
 0x62e   : > { %3777 = shalt.err (!%p3774_p11)
}
 0x62f   : > { %s3778_s29 = scalar_lea.hbm %s4451_s18, 128  ;;  %s3782_s1 = scalar_lea.hbm %s4495_s6, 256 }
 0x630   : > { %p3779_p13 = scmp.ne.s32.totalorder %s4451_s18, %s3778_s29  ;;  %p3783_p4 = scmp.lt.s32.totalorder %s4451_s18, %s4495_s6 }
 0x631   : > { %p3784_p6 = scmp.lt.s32.totalorder %s3782_s1, %s3778_s29 }
 0x632   : > { %p3780_p1 = pnand %p3779_p13, %p4515_p7 }
 0x633   : > { %p3785_p5 = por %p3784_p6, %p3783_p4 }
 0x634   : > { %p3781_p3 = pneg %p3780_p1 }
 0x636   : > { %p3786_p8 = pnand %p3785_p5, %p3781_p3 }
 0x638   : > { %3789 = shalt.err (!%p3786_p8)
}
 0x639   : > { %3511 = dma.vmem_to_hbm [thread:$0]  (%p4515_p7), %s3129_s8, 128, %s4451_s18, %s3115_s25  }
 0x63a PF: > { %s3140_s26 = sand.u32 1, %s3824_s21   ;;  %p4516_p10 = scmp.ne.s32.totalorder %s4507_s17, 0 }
 0x63b   : > { %p4517_p0 = scmp.ge.s32.totalorder %s3836_s24, 2  ;;  %s3141_s30 = scalar_lea.sflag [#allocation4], %s3140_s26 }
 0x63d   : > { %p3531_p12 = pnand %p4517_p0, %p4516_p10 }
 0x63f   : > { %p3532_p2 = pneg %p3531_p12 }
 0x641   : > { %3819 = dma.done.wait (%p3532_p2), %s3141_s30, 128  }
 0x642   : > { %3821 = vsyncadd (%p3532_p2), %s3141_s30, 4294967168  ;;  %p21_p9 = scmp.ge.s32.totalorder %s4000_s9, 4   ;;  %s4518_s21 = smov %s3828_s22 }
 0x643   : > { %s4519_s22 = smov %s3832_s23  ;;  %s4520_s23 = smov %s4011_s14 }
 0x644   : > { %s4521_s24 = smov %s4000_s9  ;;  %23 = sbr.rel (!%p21_p9) target bundleno = 9 (0x9), region = 105 }
 0x649   :  { %3146 = vsyncpa [#allocation3], 1 }
 0x64a   :  { %3148 = vsyncpa [#allocation3 + $0x1], 1 }
 0x64b   :  { %3149 = vsyncpa [#allocation6], 1 }
 0x64c   :  { %3150 = vsyncpa [#allocation9], 1 }
 0x64d   :  { %3151 = vsyncpa [#allocation4], 1 }
 0x64e   :  { %3153 = vsyncpa [#allocation4 + $0x1], 1 }

</bundles_post_ra>
